<compile_context>
chip_gen: v5e
topology: v5e:2x2
jax: 0.10.0
libtpu: 0.0.40
codegen_flags: <defaults>
</compile_context>

<pallas_src>
import functools

import jax
import jax.numpy as jnp
from jax.experimental import pallas as pl
from jax.experimental.pallas import tpu as pltpu

EPS = 1e-5
LANE = 128
MXU_DTYPE = jnp.bfloat16       # matmul-operand dtype (f32 accumulation on the MXU)
ACT_DTYPE = jnp.bfloat16       # HBM dtype of intermediate activations + residual (halves traffic)


def _round_up(x, m):
    return (x + m - 1) // m * m


def _vmem_limit_bytes():
    """Per-generation scoped-VMEM budget: ~48 MiB on v7x (64 MiB physical), up to 96 MiB on
    v5e/v6e (128 MiB physical).  Falls back to a conservative 32 MiB if the query fails."""
    try:
        cap = int(getattr(pltpu.get_tpu_info(), "vmem_capacity_bytes", 0) or 0)
        if cap > 0:
            return min(cap * 3 // 4, 96 * 1024 * 1024)
    except Exception:
        pass
    return 32 * 1024 * 1024


def _compiler_params(vmem_limit):
    # Row tiles are fully independent (per-tile stat partials) -> "parallel" grid axis,
    # which lets v7x shard the row grid across its two TensorCores.
    return pltpu.CompilerParams(
        dimension_semantics=("parallel",),
        vmem_limit_bytes=int(vmem_limit),
    )


def _row_spec(tile_rows, cols):
    return pl.BlockSpec((tile_rows, cols), lambda i: (i, 0))


def _fixed_spec(shape):
    # Whole array, same block for every grid step (weights / scale / shift): DMA'd once.
    return pl.BlockSpec(shape, lambda i: (0,) * len(shape))


def _stat_spec(cols):
    # Per-tile (2, C) partial: row 0 = sum, row 1 = sum of squares.
    return pl.BlockSpec((2, cols), lambda i: (0, i))


def _partial_stats(hb):
    """(tile_rows, C) activation (any dtype) -> (2, C) f32 block [sum; sum of squares]."""
    hf = hb.astype(jnp.float32)
    s = jnp.sum(hf, axis=0, keepdims=True)
    sq = jnp.sum(hf * hf, axis=0, keepdims=True)
    return jnp.concatenate([s, sq], axis=0)


# ---------------------------------------------------------------------------
# Kernels
# ---------------------------------------------------------------------------
def _conv1_kernel(x_ref, w_ref, h_ref, st_ref):
    # 1x1 conv == channel matmul on the MXU (bf16 operands, f32 accumulation).
    x = x_ref[...].astype(MXU_DTYPE)                      # x is already bf16 in HBM
    h = jnp.dot(x, w_ref[...], preferred_element_type=jnp.float32)
    hb = h.astype(ACT_DTYPE)
    h_ref[...] = hb
    st_ref[...] = _partial_stats(hb)


def _conv2_kernel(h1_ref, sc_ref, sh_ref, w_ref, h2_ref, st_ref, *, seq_len):
    # BN1 as one FMA + ReLU (f32 VPU path works on every generation).
    h = h1_ref[...].astype(jnp.float32) * sc_ref[...] + sh_ref[...]
    h = jnp.maximum(h, 0.0)
    n = h.shape[0]
    # k=3 halo handled inside the tile: tiles hold whole sequences, so an in-tile sublane
    # roll plus a per-row (n,1) sequence-boundary mask produces the l-1 / l+1 neighbours.
    pos = jax.lax.broadcasted_iota(jnp.int32, (n, 1), 0) % seq_len
    h_prev = jnp.where(pos > 0, pltpu.roll(h, shift=1, axis=0), 0.0)           # row l-1
    h_next = jnp.where(pos < seq_len - 1, pltpu.roll(h, shift=n - 1, axis=0), 0.0)  # row l+1
    # K-stack the 3 taps: one matmul over K = 3*cmid_p so the taps accumulate INSIDE the MXU.
    # The f32 result is (n, cmid_p) instead of (n, 3*cmid_p) and the f32 add/mask epilogue
    # of the N-stacked variant disappears.
    hs = jnp.concatenate(
        [h_prev.astype(MXU_DTYPE), h.astype(MXU_DTYPE), h_next.astype(MXU_DTYPE)], axis=1)
    y = jnp.dot(hs, w_ref[...], preferred_element_type=jnp.float32)
    yb = y.astype(ACT_DTYPE)
    h2_ref[...] = yb
    st_ref[...] = _partial_stats(yb)


def _conv3_kernel(h2_ref, sc_ref, sh_ref, w_ref, h3_ref, st_ref):
    # BN2 as one FMA + ReLU, then 1x1 expansion conv.
    h = h2_ref[...].astype(jnp.float32) * sc_ref[...] + sh_ref[...]
    h = jnp.maximum(h, 0.0).astype(MXU_DTYPE)
    y = jnp.dot(h, w_ref[...], preferred_element_type=jnp.float32)
    yb = y.astype(ACT_DTYPE)
    h3_ref[...] = yb
    st_ref[...] = _partial_stats(yb)


def _finalize_kernel(h3_ref, x_ref, sc_ref, sh_ref, o_ref, *, cexp):
    # BN3 as one FMA + identity residual + ReLU.  Residual x (bf16 in HBM) is only read here.
    h = h3_ref[...].astype(jnp.float32) * sc_ref[...] + sh_ref[...]
    out = jnp.maximum(h + x_ref[...].astype(jnp.float32), 0.0)
    if cexp != out.shape[1]:
        out = out[:, :cexp]            # HBM output is stored UNPADDED: no padded f32 writeback
    o_ref[...] = out.astype(o_ref.dtype)


# ---------------------------------------------------------------------------
# Host-side glue
# ---------------------------------------------------------------------------
def _stats_to_scale_shift(stats, gamma, beta, n_rows):
    """Reduce per-tile (sum, sumsq) partials -> per-channel BN scale/shift (tiny JAX op)."""
    c = gamma.shape[0]
    st = stats.reshape(2, -1, c)                   # (2, num_tiles, C)
    total = jnp.sum(st[0], axis=0)
    total_sq = jnp.sum(st[1], axis=0)
    mean = total / n_rows
    # TODO(synk): E[x^2]-E[x]^2 can cancel catastrophically for very large n_rows with large
    #             activation means; switch to a mean-subtracted second pass if that regime matters.
    var = jnp.maximum(total_sq / n_rows - mean * mean, 0.0)
    scale = gamma * jax.lax.rsqrt(var + EPS)
    shift = beta - mean * scale
    return scale[None, :], shift[None, :]


def _row_cap_from_vmem(vmem_bytes, cin_p, cmid_p, cexp_p):
    """Coarse per-row VMEM cost so the row tile (double-buffered bf16 blocks + f32 temps +
    the f32 output block) stays well inside the per-generation scoped-VMEM budget."""
    act = jnp.dtype(ACT_DTYPE).itemsize
    per_row = (2 * 2 * act * (cin_p + cmid_p + cexp_p)    # double-buffered bf16 in/out blocks
               + act * 3 * cmid_p                         # K-stacked bf16 conv2 operand
               + 4 * (max(cmid_p, cexp_p) + 3 * cmid_p)   # f32 temporaries (BN/relu + stack)
               + 2 * 4 * cexp_p)                          # f32 final output block (dbl buffered)
    budget = max(vmem_bytes // 2, 4 * 1024 * 1024)
    return max(int(budget // per_row), 8)


def _pick_tile_batch(batch, seq_len, max_tile_rows, sublane):
    """#sequences per row tile.  Tiles always hold whole sequences.  Prefer the largest tile
    that fits the budget, and prefer >=2 tiles so v7x's two TensorCores both get work."""
    cands = [tb for tb in range(1, batch + 1)
             if batch % tb == 0 and (tb * seq_len) % sublane == 0]
    fitting = [tb for tb in cands if tb * seq_len <= max_tile_rows]
    if fitting:
        multi = [tb for tb in fitting if batch // tb >= 2]
        return max(multi) if multi else max(fitting)
    if cands:
        return min(cands)      # nothing fits the budget: smallest legal tile, NOT the whole array
    return batch               # last resort: single whole-array tile (block == full dims, legal)


def bottleneck_forward(x_ncl, params, *, max_tile_rows=1024):
    """x_ncl: (B, C_in, L) float32 (PyTorch NCL).  Returns (B, 4*C_mid, L) float32."""
    b, cin, seq_len = x_ncl.shape
    cmid = params["w1"].shape[1]
    cexp = params["w3"].shape[1]
    assert cexp == cin, "identity shortcut (downsample=None) needs in_channel == 4*out_channel"

    cin_p = _round_up(cin, LANE)
    cmid_p = _round_up(cmid, LANE)
    cexp_p = _round_up(cexp, LANE)
    n_rows = b * seq_len

    vmem_limit = _vmem_limit_bytes()
    row_cap = min(max_tile_rows, _row_cap_from_vmem(vmem_limit, cin_p, cmid_p, cexp_p))
    sublane = 32 // jnp.dtype(ACT_DTYPE).itemsize            # 16 rows for bf16 tiles
    tile_b = _pick_tile_batch(b, seq_len, row_cap, sublane)
    tile_rows = tile_b * seq_len
    num_tiles = n_rows // tile_rows

    f32 = jnp.float32
    # (B, C, L) -> (B*L, C_pad) in one fused XLA copy (transpose + pad + cast).  Stored bf16
    # so the two passes that read x (conv1 + residual) move half the bytes.
    # TODO(synk): accepting a channels-last (B, L, C) input at the API boundary would drop
    #             this transpose copy entirely.
    x2d = jnp.pad(jnp.transpose(x_ncl, (0, 2, 1)).reshape(n_rows, cin),
                  ((0, 0), (0, cin_p - cin))).astype(ACT_DTYPE)

    def pad_w(w, r, c):
        return jnp.pad(w, ((0, r - w.shape[0]), (0, c - w.shape[1]))).astype(MXU_DTYPE)

    def pad_v(v, n_, fill):
        v = v.reshape(-1).astype(f32)
        return jnp.pad(v, (0, n_ - v.shape[0]), constant_values=fill)

    w1 = pad_w(params["w1"], cin_p, cmid_p)
    # K-stacked conv2 weight: (3*cmid_p, cmid_p) = [W_tap0 ; W_tap1 ; W_tap2]
    w2 = jnp.concatenate([pad_w(params["w2"][k], cmid_p, cmid_p) for k in range(3)], axis=0)
    w3 = pad_w(params["w3"], cmid_p, cexp_p)
    g1, b1 = pad_v(params["g1"], cmid_p, 1.0), pad_v(params["b1"], cmid_p, 0.0)
    g2, b2 = pad_v(params["g2"], cmid_p, 1.0), pad_v(params["b2"], cmid_p, 0.0)
    g3, b3 = pad_v(params["g3"], cexp_p, 1.0), pad_v(params["b3"], cexp_p, 0.0)

    cp = _compiler_params(vmem_limit)

    def stat_shape(c):
        return jax.ShapeDtypeStruct((2, num_tiles * c), f32)

    # ---- pass 1: conv1 + BN1 stat partials -------------------------------------------
    h1, st1 = pl.pallas_call(
        _conv1_kernel,
        grid=(num_tiles,),
        in_specs=[_row_spec(tile_rows, cin_p), _fixed_spec((cin_p, cmid_p))],
        out_specs=[_row_spec(tile_rows, cmid_p), _stat_spec(cmid_p)],
        out_shape=[jax.ShapeDtypeStruct((n_rows, cmid_p), ACT_DTYPE), stat_shape(cmid_p)],
        compiler_params=cp,
    )(x2d, w1)
    sc1, sh1 = _stats_to_scale_shift(st1, g1, b1, n_rows)

    # ---- pass 2: BN1+ReLU, conv2 (K-stacked 3-tap) + BN2 stat partials -----------------
    h2, st2 = pl.pallas_call(
        functools.partial(_conv2_kernel, seq_len=seq_len),
        grid=(num_tiles,),
        in_specs=[_row_spec(tile_rows, cmid_p),
                  _fixed_spec((1, cmid_p)), _fixed_spec((1, cmid_p)),
                  _fixed_spec((3 * cmid_p, cmid_p))],
        out_specs=[_row_spec(tile_rows, cmid_p), _stat_spec(cmid_p)],
        out_shape=[jax.ShapeDtypeStruct((n_rows, cmid_p), ACT_DTYPE), stat_shape(cmid_p)],
        compiler_params=cp,
    )(h1, sc1, sh1, w2)
    sc2, sh2 = _stats_to_scale_shift(st2, g2, b2, n_rows)

    # ---- pass 3: BN2+ReLU, conv3 + BN3 stat partials -----------------------------------
    h3, st3 = pl.pallas_call(
        _conv3_kernel,
        grid=(num_tiles,),
        in_specs=[_row_spec(tile_rows, cmid_p),
                  _fixed_spec((1, cmid_p)), _fixed_spec((1, cmid_p)),
                  _fixed_spec((cmid_p, cexp_p))],
        out_specs=[_row_spec(tile_rows, cexp_p), _stat_spec(cexp_p)],
        out_shape=[jax.ShapeDtypeStruct((n_rows, cexp_p), ACT_DTYPE), stat_shape(cexp_p)],
        compiler_params=cp,
    )(h2, sc2, sh2, w3)
    sc3, sh3 = _stats_to_scale_shift(st3, g3, b3, n_rows)

    # ---- pass 4: BN3 + identity residual + ReLU (unpadded-channel f32 output) ----------
    out2d = pl.pallas_call(
        functools.partial(_finalize_kernel, cexp=cexp),
        grid=(num_tiles,),
        in_specs=[_row_spec(tile_rows, cexp_p), _row_spec(tile_rows, cin_p),
                  _fixed_spec((1, cexp_p)), _fixed_spec((1, cexp_p))],
        out_specs=_row_spec(tile_rows, cexp),
        out_shape=jax.ShapeDtypeStruct((n_rows, cexp), f32),
        compiler_params=cp,
    )(h3, x2d, sc3, sh3)

    return jnp.transpose(out2d.reshape(b, seq_len, cexp), (0, 2, 1))


# ---------------------------------------------------------------------------
# References
# ---------------------------------------------------------------------------
def bottleneck_reference_f32(x_ncl, params):
    """Strict-f32 reference with the original module's math (training-mode BatchNorm)."""
    hi = jax.lax.Precision.HIGHEST
    x = jnp.transpose(x_ncl, (0, 2, 1)).astype(jnp.float32)   # (B, L, Cin)
    seq_len = x.shape[1]

    def bn(h, g, b):
        mean = jnp.mean(h, axis=(0, 1), keepdims=True)
        var = jnp.mean((h - mean) ** 2, axis=(0, 1), keepdims=True)
        return (h - mean) / jnp.sqrt(var + EPS) * g + b

    h = jnp.dot(x, params["w1"], precision=hi)
    h = jax.nn.relu(bn(h, params["g1"], params["b1"]))
    hp = jnp.pad(h, ((0, 0), (1, 1), (0, 0)))
    h = (jnp.dot(hp[:, 0:seq_len], params["w2"][0], precision=hi)
         + jnp.dot(hp[:, 1:seq_len + 1], params["w2"][1], precision=hi)
         + jnp.dot(hp[:, 2:seq_len + 2], params["w2"][2], precision=hi))
    h = jax.nn.relu(bn(h, params["g2"], params["b2"]))
    h = bn(jnp.dot(h, params["w3"], precision=hi), params["g3"], params["b3"])
    return jnp.transpose(jax.nn.relu(h + x), (0, 2, 1))


def bottleneck_reference_matched(x_ncl, params):
    """Reference mirroring the kernel's rounding points (bf16 MXU operands, bf16 intermediate
    activations and bf16-stored residual, f32 accumulation and BatchNorm arithmetic,
    K-stacked conv2)."""
    f32 = jnp.float32
    x = jnp.transpose(x_ncl, (0, 2, 1)).astype(f32)
    seq_len = x.shape[1]
    xq = x.astype(ACT_DTYPE).astype(f32)          # x is stored bf16 in HBM

    def mm(a, w):
        return jnp.dot(a.astype(MXU_DTYPE), w.astype(MXU_DTYPE), preferred_element_type=f32)

    def act(h):
        return h.astype(ACT_DTYPE).astype(f32)

    def bn(h, g, b):
        mean = jnp.mean(h, axis=(0, 1), keepdims=True)
        var = jnp.mean(h * h, axis=(0, 1), keepdims=True) - mean * mean
        scale = g * jax.lax.rsqrt(var + EPS)
        return h * scale + (b - mean * scale)

    h = act(mm(xq, params["w1"]))
    h = jax.nn.relu(bn(h, params["g1"], params["b1"]))
    hp = jnp.pad(h, ((0, 0), (1, 1), (0, 0)))
    hs = jnp.concatenate([hp[:, 0:seq_len], hp[:, 1:seq_len + 1], hp[:, 2:seq_len + 2]], axis=-1)
    w2k = jnp.concatenate([params["w2"][0], params["w2"][1], params["w2"][2]], axis=0)
    h = act(mm(hs, w2k))
    h = jax.nn.relu(bn(h, params["g2"], params["b2"]))
    h = act(mm(h, params["w3"]))
    h = bn(h, params["g3"], params["b3"])
    return jnp.transpose(jax.nn.relu(h + xq), (0, 2, 1))


if __name__ == "__main__":
    key = jax.random.PRNGKey(0)
    ks = jax.random.split(key, 10)

    # Small shapes; in_channel = out_channel * expansion so the identity shortcut matches.
    B, OUT_C, EXP, L = 2, 4, 4, 16
    IN_C = OUT_C * EXP                                            # 16

    x = jax.random.normal(ks[0], (B, IN_C, L), jnp.float32)       # NCL, like PyTorch

    params = {
        # conv weights stored as (C_in, C_out) per tap: w2[k] == conv2.weight[:, :, k].T
        "w1": 0.2 * jax.random.normal(ks[1], (IN_C, OUT_C), jnp.float32),
        "w2": 0.2 * jax.random.normal(ks[2], (3, OUT_C, OUT_C), jnp.float32),
        "w3": 0.2 * jax.random.normal(ks[3], (OUT_C, OUT_C * EXP), jnp.float32),
        # BatchNorm affine params, (C,)
        "g1": 1.0 + 0.1 * jax.random.normal(ks[4], (OUT_C,), jnp.float32),
        "b1": 0.1 * jax.random.normal(ks[5], (OUT_C,), jnp.float32),
        "g2": 1.0 + 0.1 * jax.random.normal(ks[6], (OUT_C,), jnp.float32),
        "b2": 0.1 * jax.random.normal(ks[7], (OUT_C,), jnp.float32),
        "g3": 1.0 + 0.1 * jax.random.normal(ks[8], (OUT_C * EXP,), jnp.float32),
        "b3": 0.1 * jax.random.normal(ks[9], (OUT_C * EXP,), jnp.float32),
    }

    # max_tile_rows=16 forces a 2-step row grid even at toy shapes, exercising the
    # tiled/pipelined path and the cross-tile BatchNorm stat reduction.
    fwd = jax.jit(functools.partial(bottleneck_forward, max_tile_rows=16))
    out = jax.block_until_ready(fwd(x, params))

    ref_m = jax.block_until_ready(bottleneck_reference_matched(x, params))
    ref_f = jax.block_until_ready(bottleneck_reference_f32(x, params))

    assert out.shape == (B, OUT_C * EXP, L), out.shape
    # Tight check against a reference with identical rounding points.
    assert jnp.allclose(out, ref_m, atol=2e-3, rtol=2e-3), float(jnp.max(jnp.abs(out - ref_m)))
    # Loose bound vs strict-f32 math (only delta: bf16 MXU operands / bf16 intermediates /
    # bf16-stored residual).
    assert jnp.allclose(out, ref_f, atol=1e-1, rtol=1e-1), float(jnp.max(jnp.abs(out - ref_f)))
    print("KERNEL_OK")
</pallas_src>

<mosaic_0001>
module attributes {stable_mosaic.version = 11 : i64} {
  func.func @_conv1_kernel(%arg0: i32, %arg1: memref<16x128xbf16, #tpu.memory_space<vmem>>, %arg2: memref<128x128xbf16, #tpu.memory_space<vmem>>, %arg3: memref<16x128xbf16, #tpu.memory_space<vmem>>, %arg4: memref<2x128xf32, #tpu.memory_space<vmem>>) attributes {dimension_semantics = [#tpu.dimension_semantics<parallel>], iteration_bounds = array<i64: 2>, scalar_prefetch = 0 : i64, scratch_operands = 0 : i64, tpu.core_type = #tpu.core_type<tc>, window_params = [{transform_indices = @transform_0, window_bounds = array<i64: 16, 128>}, {pipeline_mode = #tpu.pipeline_mode<synchronous>, transform_indices = @transform_1, window_bounds = array<i64: 128, 128>}, {transform_indices = @transform_2, window_bounds = array<i64: 16, 128>}, {transform_indices = @transform_3, window_bounds = array<i64: 2, 128>}]} {
    %c0 = arith.constant 0 : index
    %c0_0 = arith.constant 0 : index
    %0 = vector.load %arg1[%c0, %c0_0] : memref<16x128xbf16, #tpu.memory_space<vmem>>, vector<16x128xbf16>
    %c0_1 = arith.constant 0 : index
    %c0_2 = arith.constant 0 : index
    %1 = vector.load %arg2[%c0_1, %c0_2] : memref<128x128xbf16, #tpu.memory_space<vmem>>, vector<128x128xbf16>
    %cst = arith.constant dense<0.000000e+00> : vector<16x128xf32>
    %2 = tpu.matmul %0, %1, %cst {dimension_numbers = #tpu.dot_dimension_numbers<[1], [0], [0], [1], [0, 0, 1, 1], [], []>} : vector<16x128xbf16>, vector<128x128xbf16>, vector<16x128xf32> -> vector<16x128xf32>
    %3 = arith.truncf %2 : vector<16x128xf32> to vector<16x128xbf16>
    %c0_3 = arith.constant 0 : index
    %c0_4 = arith.constant 0 : index
    %4 = vector.load %arg3[%c0_3, %c0_4] : memref<16x128xbf16, #tpu.memory_space<vmem>>, vector<16x128xbf16>
    tpu.vector_store %arg3[%c0_3, %c0_4], %3 {strides = array<i32>} : memref<16x128xbf16, #tpu.memory_space<vmem>>, vector<16x128xbf16>,
    %5 = arith.extf %3 : vector<16x128xbf16> to vector<16x128xf32>
    %cst_5 = arith.constant dense<0.000000e+00> : vector<128xf32>
    %6 = vector.multi_reduction <add>, %5, %cst_5 [0] : vector<16x128xf32> to vector<128xf32>
    %7 = vector.shape_cast %6 : vector<128xf32> to vector<1x128xf32>
    %8 = arith.mulf %5, %5 : vector<16x128xf32>
    %cst_6 = arith.constant dense<0.000000e+00> : vector<128xf32>
    %9 = vector.multi_reduction <add>, %8, %cst_6 [0] : vector<16x128xf32> to vector<128xf32>
    %10 = vector.shape_cast %9 : vector<128xf32> to vector<1x128xf32>
    %11 = tpu.concatenate %7, %10 in 0 : vector<1x128xf32>, vector<1x128xf32> -> vector<2x128xf32>
    %c0_7 = arith.constant 0 : index
    %c0_8 = arith.constant 0 : index
    %12 = vector.load %arg4[%c0_7, %c0_8] : memref<2x128xf32, #tpu.memory_space<vmem>>, vector<2x128xf32>
    tpu.vector_store %arg4[%c0_7, %c0_8], %11 {strides = array<i32>} : memref<2x128xf32, #tpu.memory_space<vmem>>, vector<2x128xf32>,
    return
  }
  func.func @transform_0(%arg0: i32) -> (i32, i32) {
    %c0_i32 = arith.constant 0 : i32
    %c0_i32_0 = arith.constant 0 : i32
    return %arg0, %c0_i32 : i32, i32
  }
  func.func @transform_1(%arg0: i32) -> (i32, i32) {
    %c0_i32 = arith.constant 0 : i32
    %c0_i32_0 = arith.constant 0 : i32
    %c0_i32_1 = arith.constant 0 : i32
    return %c0_i32, %c0_i32_0 : i32, i32
  }
  func.func @transform_2(%arg0: i32) -> (i32, i32) {
    %c0_i32 = arith.constant 0 : i32
    %c0_i32_0 = arith.constant 0 : i32
    return %arg0, %c0_i32 : i32, i32
  }
  func.func @transform_3(%arg0: i32) -> (i32, i32) {
    %c0_i32 = arith.constant 0 : i32
    %c0_i32_0 = arith.constant 0 : i32
    return %c0_i32, %arg0 : i32, i32
  }
}

module attributes {stable_mosaic.version = 11 : i64} {
  func.func @_conv2_kernel(%arg0: i32, %arg1: memref<16x128xbf16, #tpu.memory_space<vmem>>, %arg2: memref<1x128xf32, #tpu.memory_space<vmem>>, %arg3: memref<1x128xf32, #tpu.memory_space<vmem>>, %arg4: memref<384x128xbf16, #tpu.memory_space<vmem>>, %arg5: memref<16x128xbf16, #tpu.memory_space<vmem>>, %arg6: memref<2x128xf32, #tpu.memory_space<vmem>>) attributes {dimension_semantics = [#tpu.dimension_semantics<parallel>], iteration_bounds = array<i64: 2>, scalar_prefetch = 0 : i64, scratch_operands = 0 : i64, tpu.core_type = #tpu.core_type<tc>, window_params = [{transform_indices = @transform_0, window_bounds = array<i64: 16, 128>}, {pipeline_mode = #tpu.pipeline_mode<synchronous>, transform_indices = @transform_1, window_bounds = array<i64: 1, 128>}, {pipeline_mode = #tpu.pipeline_mode<synchronous>, transform_indices = @transform_2, window_bounds = array<i64: 1, 128>}, {pipeline_mode = #tpu.pipeline_mode<synchronous>, transform_indices = @transform_3, window_bounds = array<i64: 384, 128>}, {transform_indices = @transform_4, window_bounds = array<i64: 16, 128>}, {transform_indices = @transform_5, window_bounds = array<i64: 2, 128>}]} {
    %c0 = arith.constant 0 : index
    %c0_0 = arith.constant 0 : index
    %0 = vector.load %arg1[%c0, %c0_0] : memref<16x128xbf16, #tpu.memory_space<vmem>>, vector<16x128xbf16>
    %1 = arith.extf %0 : vector<16x128xbf16> to vector<16x128xf32>
    %c0_1 = arith.constant 0 : index
    %c0_2 = arith.constant 0 : index
    %2 = vector.load %arg2[%c0_1, %c0_2] : memref<1x128xf32, #tpu.memory_space<vmem>>, vector<1x128xf32>
    %3 = vector.broadcast %2 : vector<1x128xf32> to vector<16x128xf32>
    %4 = arith.mulf %1, %3 : vector<16x128xf32>
    %c0_3 = arith.constant 0 : index
    %c0_4 = arith.constant 0 : index
    %5 = vector.load %arg3[%c0_3, %c0_4] : memref<1x128xf32, #tpu.memory_space<vmem>>, vector<1x128xf32>
    %6 = vector.broadcast %5 : vector<1x128xf32> to vector<16x128xf32>
    %7 = arith.addf %4, %6 : vector<16x128xf32>
    %cst = arith.constant 0.000000e+00 : f32
    %8 = vector.broadcast %cst : f32 to vector<16x128xf32>
    %9 = arith.maximumf %7, %8 : vector<16x128xf32>
    %10 = tpu.iota {dimensions = array<i32: 0>} : vector<16x1xi32>
    %c16_i32 = arith.constant 16 : i32
    %c0_i32 = arith.constant 0 : i32
    %11 = arith.cmpi eq, %c16_i32, %c0_i32 : i32
    %c1_i32 = arith.constant 1 : i32
    %12 = arith.select %11, %c1_i32, %c16_i32 : i32
    %13 = vector.broadcast %12 : i32 to vector<16x1xi32>
    %14 = arith.remsi %10, %13 : vector<16x1xi32>
    %c0_i32_5 = arith.constant 0 : i32
    %15 = vector.broadcast %c0_i32_5 : i32 to vector<16x1xi32>
    %16 = arith.cmpi ne, %14, %15 : vector<16x1xi32>
    %c0_i32_6 = arith.constant 0 : i32
    %17 = vector.broadcast %c0_i32_6 : i32 to vector<16x1xi32>
    %18 = arith.cmpi slt, %14, %17 : vector<16x1xi32>
    %c0_i32_7 = arith.constant 0 : i32
    %19 = arith.cmpi slt, %12, %c0_i32_7 : i32
    %20 = vector.broadcast %19 : i1 to vector<16x1xi1>
    %21 = vector.broadcast %20 : vector<16x1xi1> to vector<16x1xi1>
    %22 = arith.xori %18, %21 : vector<16x1xi1>
    %23 = arith.andi %22, %16 : vector<16x1xi1>
    %24 = vector.broadcast %12 : i32 to vector<16x1xi32>
    %25 = arith.addi %14, %24 : vector<16x1xi32>
    %26 = arith.select %23, %25, %14 : vector<16x1xi1>, vector<16x1xi32>
    %c0_i32_8 = arith.constant 0 : i32
    %27 = vector.broadcast %c0_i32_8 : i32 to vector<16x1xi32>
    %28 = arith.cmpi sgt, %26, %27 : vector<16x1xi32>
    %c1_i32_9 = arith.constant 1 : i32
    %29 = tpu.dynamic_rotate %9 by %c1_i32_9 dim 0 : vector<16x128xf32>, i32 -> vector<16x128xf32>
    %cst_10 = arith.constant 0.000000e+00 : f32
    %30 = vector.shape_cast %28 : vector<16x1xi1> to vector<16x1xi1>
    %31 = vector.broadcast %30 : vector<16x1xi1> to vector<16x128xi1>
    %32 = vector.broadcast %cst_10 : f32 to vector<16x128xf32>
    %33 = arith.select %31, %29, %32 : vector<16x128xi1>, vector<16x128xf32>
    %c15_i32 = arith.constant 15 : i32
    %34 = vector.broadcast %c15_i32 : i32 to vector<16x1xi32>
    %35 = arith.cmpi slt, %26, %34 : vector<16x1xi32>
    %c15_i32_11 = arith.constant 15 : i32
    %36 = tpu.dynamic_rotate %9 by %c15_i32_11 dim 0 : vector<16x128xf32>, i32 -> vector<16x128xf32>
    %cst_12 = arith.constant 0.000000e+00 : f32
    %37 = vector.shape_cast %35 : vector<16x1xi1> to vector<16x1xi1>
    %38 = vector.broadcast %37 : vector<16x1xi1> to vector<16x128xi1>
    %39 = vector.broadcast %cst_12 : f32 to vector<16x128xf32>
    %40 = arith.select %38, %36, %39 : vector<16x128xi1>, vector<16x128xf32>
    %41 = arith.truncf %33 : vector<16x128xf32> to vector<16x128xbf16>
    %42 = arith.truncf %9 : vector<16x128xf32> to vector<16x128xbf16>
    %43 = arith.truncf %40 : vector<16x128xf32> to vector<16x128xbf16>
    %44 = tpu.concatenate %41, %42, %43 in 1 : vector<16x128xbf16>, vector<16x128xbf16>, vector<16x128xbf16> -> vector<16x384xbf16>
    %c0_13 = arith.constant 0 : index
    %c0_14 = arith.constant 0 : index
    %45 = vector.load %arg4[%c0_13, %c0_14] : memref<384x128xbf16, #tpu.memory_space<vmem>>, vector<384x128xbf16>
    %cst_15 = arith.constant dense<0.000000e+00> : vector<16x128xf32>
    %46 = tpu.matmul %44, %45, %cst_15 {dimension_numbers = #tpu.dot_dimension_numbers<[1], [0], [0], [1], [0, 0, 1, 1], [], []>} : vector<16x384xbf16>, vector<384x128xbf16>, vector<16x128xf32> -> vector<16x128xf32>
    %47 = arith.truncf %46 : vector<16x128xf32> to vector<16x128xbf16>
    %c0_16 = arith.constant 0 : index
    %c0_17 = arith.constant 0 : index
    %48 = vector.load %arg5[%c0_16, %c0_17] : memref<16x128xbf16, #tpu.memory_space<vmem>>, vector<16x128xbf16>
    tpu.vector_store %arg5[%c0_16, %c0_17], %47 {strides = array<i32>} : memref<16x128xbf16, #tpu.memory_space<vmem>>, vector<16x128xbf16>,
    %49 = arith.extf %47 : vector<16x128xbf16> to vector<16x128xf32>
    %cst_18 = arith.constant dense<0.000000e+00> : vector<128xf32>
    %50 = vector.multi_reduction <add>, %49, %cst_18 [0] : vector<16x128xf32> to vector<128xf32>
    %51 = vector.shape_cast %50 : vector<128xf32> to vector<1x128xf32>
    %52 = arith.mulf %49, %49 : vector<16x128xf32>
    %cst_19 = arith.constant dense<0.000000e+00> : vector<128xf32>
    %53 = vector.multi_reduction <add>, %52, %cst_19 [0] : vector<16x128xf32> to vector<128xf32>
    %54 = vector.shape_cast %53 : vector<128xf32> to vector<1x128xf32>
    %55 = tpu.concatenate %51, %54 in 0 : vector<1x128xf32>, vector<1x128xf32> -> vector<2x128xf32>
    %c0_20 = arith.constant 0 : index
    %c0_21 = arith.constant 0 : index
    %56 = vector.load %arg6[%c0_20, %c0_21] : memref<2x128xf32, #tpu.memory_space<vmem>>, vector<2x128xf32>
    tpu.vector_store %arg6[%c0_20, %c0_21], %55 {strides = array<i32>} : memref<2x128xf32, #tpu.memory_space<vmem>>, vector<2x128xf32>,
    return
  }
  func.func @transform_0(%arg0: i32) -> (i32, i32) {
    %c0_i32 = arith.constant 0 : i32
    %c0_i32_0 = arith.constant 0 : i32
    return %arg0, %c0_i32 : i32, i32
  }
  func.func @transform_1(%arg0: i32) -> (i32, i32) {
    %c0_i32 = arith.constant 0 : i32
    %c0_i32_0 = arith.constant 0 : i32
    %c0_i32_1 = arith.constant 0 : i32
    return %c0_i32, %c0_i32_0 : i32, i32
  }
  func.func @transform_2(%arg0: i32) -> (i32, i32) {
    %c0_i32 = arith.constant 0 : i32
    %c0_i32_0 = arith.constant 0 : i32
    %c0_i32_1 = arith.constant 0 : i32
    return %c0_i32, %c0_i32_0 : i32, i32
  }
  func.func @transform_3(%arg0: i32) -> (i32, i32) {
    %c0_i32 = arith.constant 0 : i32
    %c0_i32_0 = arith.constant 0 : i32
    %c0_i32_1 = arith.constant 0 : i32
    return %c0_i32, %c0_i32_0 : i32, i32
  }
  func.func @transform_4(%arg0: i32) -> (i32, i32) {
    %c0_i32 = arith.constant 0 : i32
    %c0_i32_0 = arith.constant 0 : i32
    return %arg0, %c0_i32 : i32, i32
  }
  func.func @transform_5(%arg0: i32) -> (i32, i32) {
    %c0_i32 = arith.constant 0 : i32
    %c0_i32_0 = arith.constant 0 : i32
    return %c0_i32, %arg0 : i32, i32
  }
}

module attributes {stable_mosaic.version = 11 : i64} {
  func.func @_conv3_kernel(%arg0: i32, %arg1: memref<16x128xbf16, #tpu.memory_space<vmem>>, %arg2: memref<1x128xf32, #tpu.memory_space<vmem>>, %arg3: memref<1x128xf32, #tpu.memory_space<vmem>>, %arg4: memref<128x128xbf16, #tpu.memory_space<vmem>>, %arg5: memref<16x128xbf16, #tpu.memory_space<vmem>>, %arg6: memref<2x128xf32, #tpu.memory_space<vmem>>) attributes {dimension_semantics = [#tpu.dimension_semantics<parallel>], iteration_bounds = array<i64: 2>, scalar_prefetch = 0 : i64, scratch_operands = 0 : i64, tpu.core_type = #tpu.core_type<tc>, window_params = [{transform_indices = @transform_0, window_bounds = array<i64: 16, 128>}, {pipeline_mode = #tpu.pipeline_mode<synchronous>, transform_indices = @transform_1, window_bounds = array<i64: 1, 128>}, {pipeline_mode = #tpu.pipeline_mode<synchronous>, transform_indices = @transform_2, window_bounds = array<i64: 1, 128>}, {pipeline_mode = #tpu.pipeline_mode<synchronous>, transform_indices = @transform_3, window_bounds = array<i64: 128, 128>}, {transform_indices = @transform_4, window_bounds = array<i64: 16, 128>}, {transform_indices = @transform_5, window_bounds = array<i64: 2, 128>}]} {
    %c0 = arith.constant 0 : index
    %c0_0 = arith.constant 0 : index
    %0 = vector.load %arg1[%c0, %c0_0] : memref<16x128xbf16, #tpu.memory_space<vmem>>, vector<16x128xbf16>
    %1 = arith.extf %0 : vector<16x128xbf16> to vector<16x128xf32>
    %c0_1 = arith.constant 0 : index
    %c0_2 = arith.constant 0 : index
    %2 = vector.load %arg2[%c0_1, %c0_2] : memref<1x128xf32, #tpu.memory_space<vmem>>, vector<1x128xf32>
    %3 = vector.broadcast %2 : vector<1x128xf32> to vector<16x128xf32>
    %4 = arith.mulf %1, %3 : vector<16x128xf32>
    %c0_3 = arith.constant 0 : index
    %c0_4 = arith.constant 0 : index
    %5 = vector.load %arg3[%c0_3, %c0_4] : memref<1x128xf32, #tpu.memory_space<vmem>>, vector<1x128xf32>
    %6 = vector.broadcast %5 : vector<1x128xf32> to vector<16x128xf32>
    %7 = arith.addf %4, %6 : vector<16x128xf32>
    %cst = arith.constant 0.000000e+00 : f32
    %8 = vector.broadcast %cst : f32 to vector<16x128xf32>
    %9 = arith.maximumf %7, %8 : vector<16x128xf32>
    %10 = arith.truncf %9 : vector<16x128xf32> to vector<16x128xbf16>
    %c0_5 = arith.constant 0 : index
    %c0_6 = arith.constant 0 : index
    %11 = vector.load %arg4[%c0_5, %c0_6] : memref<128x128xbf16, #tpu.memory_space<vmem>>, vector<128x128xbf16>
    %cst_7 = arith.constant dense<0.000000e+00> : vector<16x128xf32>
    %12 = tpu.matmul %10, %11, %cst_7 {dimension_numbers = #tpu.dot_dimension_numbers<[1], [0], [0], [1], [0, 0, 1, 1], [], []>} : vector<16x128xbf16>, vector<128x128xbf16>, vector<16x128xf32> -> vector<16x128xf32>
    %13 = arith.truncf %12 : vector<16x128xf32> to vector<16x128xbf16>
    %c0_8 = arith.constant 0 : index
    %c0_9 = arith.constant 0 : index
    %14 = vector.load %arg5[%c0_8, %c0_9] : memref<16x128xbf16, #tpu.memory_space<vmem>>, vector<16x128xbf16>
    tpu.vector_store %arg5[%c0_8, %c0_9], %13 {strides = array<i32>} : memref<16x128xbf16, #tpu.memory_space<vmem>>, vector<16x128xbf16>,
    %15 = arith.extf %13 : vector<16x128xbf16> to vector<16x128xf32>
    %cst_10 = arith.constant dense<0.000000e+00> : vector<128xf32>
    %16 = vector.multi_reduction <add>, %15, %cst_10 [0] : vector<16x128xf32> to vector<128xf32>
    %17 = vector.shape_cast %16 : vector<128xf32> to vector<1x128xf32>
    %18 = arith.mulf %15, %15 : vector<16x128xf32>
    %cst_11 = arith.constant dense<0.000000e+00> : vector<128xf32>
    %19 = vector.multi_reduction <add>, %18, %cst_11 [0] : vector<16x128xf32> to vector<128xf32>
    %20 = vector.shape_cast %19 : vector<128xf32> to vector<1x128xf32>
    %21 = tpu.concatenate %17, %20 in 0 : vector<1x128xf32>, vector<1x128xf32> -> vector<2x128xf32>
    %c0_12 = arith.constant 0 : index
    %c0_13 = arith.constant 0 : index
    %22 = vector.load %arg6[%c0_12, %c0_13] : memref<2x128xf32, #tpu.memory_space<vmem>>, vector<2x128xf32>
    tpu.vector_store %arg6[%c0_12, %c0_13], %21 {strides = array<i32>} : memref<2x128xf32, #tpu.memory_space<vmem>>, vector<2x128xf32>,
    return
  }
  func.func @transform_0(%arg0: i32) -> (i32, i32) {
    %c0_i32 = arith.constant 0 : i32
    %c0_i32_0 = arith.constant 0 : i32
    return %arg0, %c0_i32 : i32, i32
  }
  func.func @transform_1(%arg0: i32) -> (i32, i32) {
    %c0_i32 = arith.constant 0 : i32
    %c0_i32_0 = arith.constant 0 : i32
    %c0_i32_1 = arith.constant 0 : i32
    return %c0_i32, %c0_i32_0 : i32, i32
  }
  func.func @transform_2(%arg0: i32) -> (i32, i32) {
    %c0_i32 = arith.constant 0 : i32
    %c0_i32_0 = arith.constant 0 : i32
    %c0_i32_1 = arith.constant 0 : i32
    return %c0_i32, %c0_i32_0 : i32, i32
  }
  func.func @transform_3(%arg0: i32) -> (i32, i32) {
    %c0_i32 = arith.constant 0 : i32
    %c0_i32_0 = arith.constant 0 : i32
    %c0_i32_1 = arith.constant 0 : i32
    return %c0_i32, %c0_i32_0 : i32, i32
  }
  func.func @transform_4(%arg0: i32) -> (i32, i32) {
    %c0_i32 = arith.constant 0 : i32
    %c0_i32_0 = arith.constant 0 : i32
    return %arg0, %c0_i32 : i32, i32
  }
  func.func @transform_5(%arg0: i32) -> (i32, i32) {
    %c0_i32 = arith.constant 0 : i32
    %c0_i32_0 = arith.constant 0 : i32
    return %c0_i32, %arg0 : i32, i32
  }
}

module attributes {stable_mosaic.version = 11 : i64} {
  func.func @_finalize_kernel(%arg0: i32, %arg1: memref<16x128xbf16, #tpu.memory_space<vmem>>, %arg2: memref<16x128xbf16, #tpu.memory_space<vmem>>, %arg3: memref<1x128xf32, #tpu.memory_space<vmem>>, %arg4: memref<1x128xf32, #tpu.memory_space<vmem>>, %arg5: memref<16x16xf32, #tpu.memory_space<vmem>>) attributes {dimension_semantics = [#tpu.dimension_semantics<parallel>], iteration_bounds = array<i64: 2>, scalar_prefetch = 0 : i64, scratch_operands = 0 : i64, tpu.core_type = #tpu.core_type<tc>, window_params = [{transform_indices = @transform_0, window_bounds = array<i64: 16, 128>}, {transform_indices = @transform_1, window_bounds = array<i64: 16, 128>}, {pipeline_mode = #tpu.pipeline_mode<synchronous>, transform_indices = @transform_2, window_bounds = array<i64: 1, 128>}, {pipeline_mode = #tpu.pipeline_mode<synchronous>, transform_indices = @transform_3, window_bounds = array<i64: 1, 128>}, {transform_indices = @transform_4, window_bounds = array<i64: 16, 16>}]} {
    %c0 = arith.constant 0 : index
    %c0_0 = arith.constant 0 : index
    %0 = vector.load %arg1[%c0, %c0_0] : memref<16x128xbf16, #tpu.memory_space<vmem>>, vector<16x128xbf16>
    %1 = arith.extf %0 : vector<16x128xbf16> to vector<16x128xf32>
    %c0_1 = arith.constant 0 : index
    %c0_2 = arith.constant 0 : index
    %2 = vector.load %arg3[%c0_1, %c0_2] : memref<1x128xf32, #tpu.memory_space<vmem>>, vector<1x128xf32>
    %3 = vector.broadcast %2 : vector<1x128xf32> to vector<16x128xf32>
    %4 = arith.mulf %1, %3 : vector<16x128xf32>
    %c0_3 = arith.constant 0 : index
    %c0_4 = arith.constant 0 : index
    %5 = vector.load %arg4[%c0_3, %c0_4] : memref<1x128xf32, #tpu.memory_space<vmem>>, vector<1x128xf32>
    %6 = vector.broadcast %5 : vector<1x128xf32> to vector<16x128xf32>
    %7 = arith.addf %4, %6 : vector<16x128xf32>
    %c0_5 = arith.constant 0 : index
    %c0_6 = arith.constant 0 : index
    %8 = vector.load %arg2[%c0_5, %c0_6] : memref<16x128xbf16, #tpu.memory_space<vmem>>, vector<16x128xbf16>
    %9 = arith.extf %8 : vector<16x128xbf16> to vector<16x128xf32>
    %10 = arith.addf %7, %9 : vector<16x128xf32>
    %cst = arith.constant 0.000000e+00 : f32
    %11 = vector.broadcast %cst : f32 to vector<16x128xf32>
    %12 = arith.maximumf %10, %11 : vector<16x128xf32>
    %13 = vector.extract_strided_slice %12 {offsets = [0, 0], sizes = [16, 16], strides = [1, 1]} : vector<16x128xf32> to vector<16x16xf32>
    %c0_7 = arith.constant 0 : index
    %c0_8 = arith.constant 0 : index
    %14 = vector.load %arg5[%c0_7, %c0_8] : memref<16x16xf32, #tpu.memory_space<vmem>>, vector<16x16xf32>
    tpu.vector_store %arg5[%c0_7, %c0_8], %13 {strides = array<i32>} : memref<16x16xf32, #tpu.memory_space<vmem>>, vector<16x16xf32>,
    return
  }
  func.func @transform_0(%arg0: i32) -> (i32, i32) {
    %c0_i32 = arith.constant 0 : i32
    %c0_i32_0 = arith.constant 0 : i32
    return %arg0, %c0_i32 : i32, i32
  }
  func.func @transform_1(%arg0: i32) -> (i32, i32) {
    %c0_i32 = arith.constant 0 : i32
    %c0_i32_0 = arith.constant 0 : i32
    return %arg0, %c0_i32 : i32, i32
  }
  func.func @transform_2(%arg0: i32) -> (i32, i32) {
    %c0_i32 = arith.constant 0 : i32
    %c0_i32_0 = arith.constant 0 : i32
    %c0_i32_1 = arith.constant 0 : i32
    return %c0_i32, %c0_i32_0 : i32, i32
  }
  func.func @transform_3(%arg0: i32) -> (i32, i32) {
    %c0_i32 = arith.constant 0 : i32
    %c0_i32_0 = arith.constant 0 : i32
    %c0_i32_1 = arith.constant 0 : i32
    return %c0_i32, %c0_i32_0 : i32, i32
  }
  func.func @transform_4(%arg0: i32) -> (i32, i32) {
    %c0_i32 = arith.constant 0 : i32
    %c0_i32_0 = arith.constant 0 : i32
    return %arg0, %c0_i32 : i32, i32
  }
}

</mosaic_0001>

<bundles_post_ra>
// kernel: bottleneck_forward.4
= control target key start
LH: loop header
LB: loop body
LE: loop exit
PB: predicated region body
PF: predicated region fallthrough
CT: control target
= control target key end

     0   :  { %s481_s12 = smov 0   ;;  %s530_s0 = inlined_call_operand.vmem [shape: bf16[32,128], index: 0, kind: input, shape index: {}]   ;;  %s531_s1 = inlined_call_operand.vmem [shape: bf16[128,128], index: 1, kind: input, shape index: {}]   ;;  %s532_s2 = inlined_call_operand.vmem [shape: bf16[32,128], index: 2, kind: output, shape index: {0}]   ;;  %s533_s3 = inlined_call_operand.vmem [shape: f32[2,256], index: 3, kind: output, shape index: {1}]  }
   0x1 LB: > { %s487_s13 = sadd.s32 4294967295, %s459_s12   ;;  %p387_p0 = scmp.ge.s32.totalorder %s459_s12, 1  ;;  %s459_s12 = sphi %s481_s12, %s14_s12  }
   0x2   : > { %p141_p1 = scmp.lt.s32.totalorder %s459_s12, 3 }
   0x4   : > { %p142_p2 = pnand %p387_p0, %p141_p1 }
   0x5   : > { %s388_s22 = sshll.u32 (!%p142_p2), %s487_s13, 1  ;;  %p181_p4 = scmp.lt.s32.totalorder (!%p142_p2), %s487_s13, 1 }
   0x6   : > { %145 = sbr.rel (%p142_p2) target bundleno = 199 (0xc7), region = 28  ;;  %p170_p3 = scmp.lt.s32.totalorder (!%p142_p2), %s388_s22, 3 }
   0xb   : > { %v439_v0 = vld [vmem:[%s531_s1 + $0x38] sm:$0xff]  ;;  %v438_v1 = vld [vmem:[%s531_s1 + $0x30] sm:$0xff]  ;;  %v437_v2 = vld [vmem:[%s531_s1 + $0x28] sm:$0xff]  ;;  %s535_s22 = smov (!%p170_p3, %s388_s22), 3  ;;  %s537_s13 = smov (!%p181_p4, %s487_s13), 1  ;;  %vm293_vm0 = vcmask 1040384  }
   0xc   : > { %257 = vmatpush.bf16.msra.mxu0 %v439_v0  ;;  %v436_v3 = vld [vmem:[%s531_s1 + $0x20] sm:$0xff]  ;;  %v435_v4 = vld [vmem:[%s531_s1 + $0x18] sm:$0xff]  ;;  %v434_v5 = vld [vmem:[%s531_s1 + $0x10] sm:$0xff]  ;;  %s389_s29 = sshll.u32 %s535_s22, 2  ;;  %s392_s11 = sshll.u32 %s537_s13, 1 }
   0xd   : > { %v433_v6 = vld [vmem:[%s531_s1 + $0x8] sm:$0xff]  ;;  %v432_v7 = vld [vmem:[%s531_s1] sm:$0xff]  ;;  %s173_s7 = scalar_lea.vmem %s530_s0, %s389_s29  ;;  %s179_s10 = scalar_lea.vmem %s532_s2, %s389_s29 }
   0xe   : > { %v431_v8 = vld [vmem:[%s173_s7] sm:$0xff]  ;;  %s184_s16 = scalar_lea.vmem %s533_s3, %s392_s11 }
  0x10   : > { %258 = vmatpush.bf16.msra.mxu0 %v438_v1 }
  0x14   : > { %259 = vmatpush.bf16.msra.mxu0 %v437_v2 }
  0x18   : > { %260 = vmatpush.bf16.msra.mxu0 %v436_v3 }
  0x1c   : > { %261 = vmatpush.bf16.msra.mxu0 %v435_v4 }
  0x20   : > { %262 = vmatpush.bf16.msra.mxu0 %v434_v5 }
  0x24   : > { %263 = vmatpush.bf16.msra.mxu0 %v433_v6 }
  0x28   : > { %264 = vmatpush.bf16.msra.mxu0 %v432_v7 }
  0x2b   : > { %265 = vmatmul.bf16.vlgmr.msra.gmra.mxu0 %v431_v8 }
  0xa8   : > { %v266_v9 = vpop.f32.mrf.mxu0 }
  0xa9   : > { %v271_v10 = vpack.c.bf16 %v266_v9, %v266_v9 }
  0xab   : > { %v275_v12 = vunpack.c.l.bf16 %v271_v10 }
  0xad   : > { %v284_v16 = vmul.f32 %v275_v12, %v275_v12 }
  0xb0   : > { %v268_v11 = vpop.f32.mrf.mxu0 }
  0xb1   : > { %v272_v13 = vpack.c.bf16 %v268_v11, %v268_v11  ;;  %v443_v14 = vpack.c.bf16 %v268_v11, %v266_v9 }
  0xb3   : > { %444 = vst [vmem:[%s179_s10] sm:$0xff] %v443_v14   ;;  %v276_v15 = vunpack.c.l.bf16 %v272_v13 }
  0xb5   : > { %v277_v17 = vadd.f32 %v276_v15, %v275_v12  ;;  %v285_v18 = vmul.f32 %v276_v15, %v276_v15 }
  0xb7   : > { %v278_v19 = vrot.slane %v277_v17, 4  ;;  %v286_v20 = vadd.f32 %v285_v18, %v284_v16 }
  0xb9   : > { %v279_v21 = vadd.f32 %v278_v19, %v277_v17  ;;  %v287_v22 = vrot.slane %v286_v20, 4 }
  0xbb   : > { %v280_v23 = vrot.slane %v279_v21, 2  ;;  %v288_v24 = vadd.f32 %v287_v22, %v286_v20 }
  0xbd   : > { %v281_v25 = vadd.f32 %v280_v23, %v279_v21  ;;  %v289_v26 = vrot.slane %v288_v24, 2 }
  0xbf   : > { %v282_v27 = vrot.slane %v281_v25, 1  ;;  %v290_v28 = vadd.f32 %v289_v26, %v288_v24 }
  0xc1   : > { %v291_v29 = vrot.slane %v290_v28, 1  ;;  %v283_v30 = vadd.f32 %v282_v27, %v281_v25 }
  0xc3   : > { %v292_v31 = vadd.f32 %v291_v29, %v290_v28 }
  0xc5   : > { %v294_v32 = vsel %vm293_vm0, %v283_v30, %v292_v31 }
  0xc6   : > { %295 = vst [vmem:[%s184_s16] sm:$0x3] %v294_v32 }
  0xc7 PF: > { %s14_s12 = sadd.s32 1, %s459_s12  }
  0xc8   : > { %p11_p5 = scmp.ge.s32.totalorder %s14_s12, 4  }
  0xca   :  { %13 = sbr.rel (!%p11_p5) target bundleno = 1 (0x1), region = 70 }

// kernel: bottleneck_forward.6
= control target key start
LH: loop header
LB: loop body
LE: loop exit
PB: predicated region body
PF: predicated region fallthrough
CT: control target
= control target key end

     0   :  { %s557_s18 = smov 0   ;;  %s619_s0 = inlined_call_operand.vmem [shape: bf16[32,128], index: 0, kind: input, shape index: {}]   ;;  %s620_s1 = inlined_call_operand.vmem [shape: f32[1,128], index: 1, kind: input, shape index: {}]   ;;  %s621_s2 = inlined_call_operand.vmem [shape: f32[1,128], index: 2, kind: input, shape index: {}]   ;;  %s622_s3 = inlined_call_operand.vmem [shape: bf16[128,128], index: 3, kind: input, shape index: {}]   ;;  %s623_s4 = inlined_call_operand.vmem [shape: bf16[32,128], index: 4, kind: output, shape index: {0}]   ;;  %s624_s5 = inlined_call_operand.vmem [shape: f32[2,256], index: 5, kind: output, shape index: {1}]  }
   0x1 LB: > { %s563_s19 = sadd.s32 4294967295, %s525_s18   ;;  %p452_p0 = scmp.ge.s32.totalorder %s525_s18, 1  ;;  %s525_s18 = sphi %s557_s18, %s16_s18  }
   0x2   : > { %p191_p1 = scmp.lt.s32.totalorder %s525_s18, 3 }
   0x4   : > { %p192_p2 = pnand %p452_p0, %p191_p1 }
   0x5   : > { %s453_s22 = sshll.u32 (!%p192_p2), %s563_s19, 1  ;;  %p235_p4 = scmp.lt.s32.totalorder (!%p192_p2), %s563_s19, 1 }
   0x6   : > { %195 = sbr.rel (%p192_p2) target bundleno = 199 (0xc7), region = 36  ;;  %p224_p3 = scmp.lt.s32.totalorder (!%p192_p2), %s453_s22, 3 }
   0xb   : > { %v499_v0 = vld [vmem:[%s622_s3 + $0x38] sm:$0xff]  ;;  %v498_v1 = vld [vmem:[%s622_s3 + $0x30] sm:$0xff]  ;;  %s626_s22 = smov (!%p224_p3, %s453_s22), 3  ;;  %v497_v2 = vld [vmem:[%s622_s3 + $0x28] sm:$0xff]  ;;  %s628_s19 = smov (!%p235_p4, %s563_s19), 1  ;;  %vm358_vm0 = vcmask 1040384  }
   0xc   : > { %322 = vmatpush.bf16.msra.mxu0 %v499_v0  ;;  %s454_s25 = sshll.u32 %s626_s22, 2  ;;  %v496_v3 = vld [vmem:[%s622_s3 + $0x20] sm:$0xff]  ;;  %v495_v8 = vld [vmem:[%s622_s3 + $0x18] sm:$0xff]  ;;  %v494_v12 = vld [vmem:[%s622_s3 + $0x10] sm:$0xff]  ;;  %s457_s22 = sshll.u32 %s628_s19, 1 }
   0xd   : > { %s227_s30 = scalar_lea.vmem %s619_s0, %s454_s25  ;;  %v517_v7 = vld [vmem:[%s620_s1] ss:$0 sm:$0xff]  ;;  %v493_v15 = vld [vmem:[%s622_s3 + $0x8] sm:$0xff]  ;;  %s233_s26 = scalar_lea.vmem %s623_s4, %s454_s25 }
   0xe   : > { %v501_v4 = vld [vmem:[%s227_s30] sm:$0xff]   ;;  %s238_s28 = scalar_lea.vmem %s624_s5, %s457_s22 }
   0xf   : > { %v502_v5 = vunpack.c.l.bf16 %v501_v4  ;;  %v503_v6 = vunpack.c.h.bf16 %v501_v4  ;;  %v518_v11 = vld [vmem:[%s621_s2] ss:$0 sm:$0xff] }
  0x10   : > { %323 = vmatpush.bf16.msra.mxu0 %v498_v1  ;;  %v492_v18 = vld [vmem:[%s622_s3] sm:$0xff] }
  0x11   : > { %v247_v9 = vmul.f32 %v517_v7, %v502_v5  ;;  %v248_v10 = vmul.f32 %v517_v7, %v503_v6 }
  0x13   : > { %v253_v13 = vadd.f32 %v518_v11, %v247_v9  ;;  %v254_v14 = vadd.f32 %v518_v11, %v248_v10 }
  0x14   : > { %324 = vmatpush.bf16.msra.mxu0 %v497_v2 }
  0x15   : > { %v255_v16 = vmax.f32 %v253_v13, 0.0  ;;  %v256_v17 = vmax.f32 %v254_v14, 0.0 }
  0x17   : > { %v257_v19 = vpack.c.bf16 %v256_v17, %v255_v16 }
  0x18   : > { %325 = vmatpush.bf16.msra.mxu0 %v496_v3 }
  0x1c   : > { %326 = vmatpush.bf16.msra.mxu0 %v495_v8 }
  0x20   : > { %327 = vmatpush.bf16.msra.mxu0 %v494_v12 }
  0x24   : > { %328 = vmatpush.bf16.msra.mxu0 %v493_v15 }
  0x28   : > { %329 = vmatpush.bf16.msra.mxu0 %v492_v18 }
  0x2b   : > { %330 = vmatmul.bf16.vlgmr.msra.gmra.mxu0 %v257_v19 }
  0xa8   : > { %v331_v20 = vpop.f32.mrf.mxu0 }
  0xa9   : > { %v336_v21 = vpack.c.bf16 %v331_v20, %v331_v20 }
  0xab   : > { %v340_v23 = vunpack.c.l.bf16 %v336_v21 }
  0xad   : > { %v349_v27 = vmul.f32 %v340_v23, %v340_v23 }
  0xb0   : > { %v333_v22 = vpop.f32.mrf.mxu0 }
  0xb1   : > { %v337_v24 = vpack.c.bf16 %v333_v22, %v333_v22  ;;  %v507_v25 = vpack.c.bf16 %v333_v22, %v331_v20 }
  0xb3   : > { %508 = vst [vmem:[%s233_s26] sm:$0xff] %v507_v25   ;;  %v341_v26 = vunpack.c.l.bf16 %v337_v24 }
  0xb5   : > { %v342_v28 = vadd.f32 %v341_v26, %v340_v23  ;;  %v350_v29 = vmul.f32 %v341_v26, %v341_v26 }
  0xb7   : > { %v343_v30 = vrot.slane %v342_v28, 4  ;;  %v351_v31 = vadd.f32 %v350_v29, %v349_v27 }
  0xb9   : > { %v344_v32 = vadd.f32 %v343_v30, %v342_v28  ;;  %v352_v33 = vrot.slane %v351_v31, 4 }
  0xbb   : > { %v345_v34 = vrot.slane %v344_v32, 2  ;;  %v353_v35 = vadd.f32 %v352_v33, %v351_v31 }
  0xbd   : > { %v346_v36 = vadd.f32 %v345_v34, %v344_v32  ;;  %v354_v37 = vrot.slane %v353_v35, 2 }
  0xbf   : > { %v347_v38 = vrot.slane %v346_v36, 1  ;;  %v355_v39 = vadd.f32 %v354_v37, %v353_v35 }
  0xc1   : > { %v356_v40 = vrot.slane %v355_v39, 1  ;;  %v348_v41 = vadd.f32 %v347_v38, %v346_v36 }
  0xc3   : > { %v357_v42 = vadd.f32 %v356_v40, %v355_v39 }
  0xc5   : > { %v359_v43 = vsel %vm358_vm0, %v348_v41, %v357_v42 }
  0xc6   : > { %360 = vst [vmem:[%s238_s28] sm:$0x3] %v359_v43 }
  0xc7 PF: > { %s16_s18 = sadd.s32 1, %s525_s18  }
  0xc8   : > { %p13_p5 = scmp.ge.s32.totalorder %s16_s18, 4  }
  0xca   :  { %15 = sbr.rel (!%p13_p5) target bundleno = 1 (0x1), region = 78 }

// kernel: bottleneck_forward.7
= control target key start
LH: loop header
LB: loop body
LE: loop exit
PB: predicated region body
PF: predicated region fallthrough
CT: control target
= control target key end

     0   :  { %s382_s15 = smov 0   ;;  %s408_s0 = inlined_call_operand.vmem [shape: bf16[32,128], index: 0, kind: input, shape index: {}]   ;;  %s409_s1 = inlined_call_operand.vmem [shape: bf16[32,128], index: 1, kind: input, shape index: {}]   ;;  %s410_s2 = inlined_call_operand.vmem [shape: f32[1,128], index: 2, kind: input, shape index: {}]   ;;  %s411_s3 = inlined_call_operand.vmem [shape: f32[1,128], index: 3, kind: input, shape index: {}]   ;;  %s412_s4 = inlined_call_operand.vmem [shape: f32[32,16], index: 4, kind: output, shape index: {}]  }
   0x1 LB: > { %s318_s16 = sadd.s32 4294967295, %s355_s15   ;;  %p322_p0 = scmp.ge.s32.totalorder %s355_s15, 1  ;;  %s355_s15 = sphi %s382_s15, %s14_s15  }
   0x2   : > { %p174_p1 = scmp.lt.s32.totalorder %s355_s15, 3 }
   0x4   : > { %p175_p2 = pnand %p322_p0, %p174_p1 }
   0x5   : > { %s323_s17 = sshll.u32 (!%p175_p2), %s318_s16, 1 }
   0x6   : > { %178 = sbr.rel (%p175_p2) target bundleno = 27 (0x1b), region = 36  ;;  %p206_p3 = scmp.lt.s32.totalorder (!%p175_p2), %s323_s17, 3 }
   0xb   : > { %s414_s17 = smov (!%p206_p3, %s323_s17), 3  ;;  %v347_v0 = vld [vmem:[%s410_s2] ss:$0 sm:$0xff]  ;;  %vm247_vm0 = vcmask 130048  }
   0xc   : > { %s324_s18 = sshll.u32 %s414_s17, 2  ;;  %v348_v5 = vld [vmem:[%s411_s3] ss:$0 sm:$0xff]  ;;  %s328_s29 = sshll.u32 %s414_s17, 3 }
   0xd   : > { %s209_s21 = scalar_lea.vmem %s408_s0, %s324_s18  ;;  %s215_s24 = scalar_lea.vmem %s409_s1, %s324_s18 }
   0xe   : > { %v332_v1 = vld [vmem:[%s209_s21] sm:$0xff]   ;;  %s221_s6 = scalar_lea.vmem %s412_s4, %s328_s29 }
   0xf   : > { %v336_v2 = vld [vmem:[%s215_s24] sm:$0xff]   ;;  %v333_v3 = vunpack.c.l.bf16 %v332_v1  ;;  %v334_v4 = vunpack.c.h.bf16 %v332_v1 }
  0x10   : > { %v337_v8 = vunpack.c.l.bf16 %v336_v2  ;;  %v338_v9 = vunpack.c.h.bf16 %v336_v2 }
  0x11   : > { %v231_v6 = vmul.f32 %v347_v0, %v333_v3  ;;  %v232_v7 = vmul.f32 %v347_v0, %v334_v4 }
  0x13   : > { %v237_v10 = vadd.f32 %v348_v5, %v231_v6  ;;  %v238_v11 = vadd.f32 %v348_v5, %v232_v7 }
  0x15   : > { %v243_v12 = vadd.f32 %v337_v8, %v237_v10  ;;  %v244_v13 = vadd.f32 %v338_v9, %v238_v11 }
  0x17   : > { %v245_v14 = vmax.f32 %v243_v12, 0.0  ;;  %v246_v15 = vmax.f32 %v244_v13, 0.0 }
  0x19   : > { %248 = vst.msk [vmem:[%s221_s6] sm:$0xff] %vm247_vm0, %v245_v14 }
  0x1a   : > { %249 = vst.msk [vmem:[%s221_s6 + $0x8] sm:$0xff] %vm247_vm0, %v246_v15 }
  0x1b PF: > { %s14_s15 = sadd.s32 1, %s355_s15  }
  0x1c   : > { %p11_p4 = scmp.ge.s32.totalorder %s14_s15, 4  }
  0x1e   :  { %13 = sbr.rel (!%p11_p4) target bundleno = 1 (0x1), region = 69 }

// kernel: bottleneck_forward.5
= control target key start
LH: loop header
LB: loop body
LE: loop exit
PB: predicated region body
PF: predicated region fallthrough
CT: control target
= control target key end

     0   :  { %s869_s18 = smov 0   ;;  %s979_s0 = inlined_call_operand.vmem [shape: bf16[32,128], index: 0, kind: input, shape index: {}]   ;;  %s980_s1 = inlined_call_operand.vmem [shape: f32[1,128], index: 1, kind: input, shape index: {}]   ;;  %s981_s2 = inlined_call_operand.vmem [shape: f32[1,128], index: 2, kind: input, shape index: {}]   ;;  %s982_s3 = inlined_call_operand.vmem [shape: bf16[384,128], index: 3, kind: input, shape index: {}]   ;;  %s983_s4 = inlined_call_operand.vmem [shape: bf16[32,128], index: 4, kind: output, shape index: {0}]   ;;  %s984_s5 = inlined_call_operand.vmem [shape: f32[2,256], index: 5, kind: output, shape index: {1}]  }
   0x1 LB: > { %s875_s19 = sadd.s32 4294967295, %s837_s18   ;;  %p684_p0 = scmp.ge.s32.totalorder %s837_s18, 1  ;;  %s837_s18 = sphi %s869_s18, %s16_s18  }
   0x2   : > { %p191_p1 = scmp.lt.s32.totalorder %s837_s18, 3 }
   0x4   : > { %p192_p2 = pnand %p684_p0, %p191_p1 }
   0x5   : > { %s685_s26 = sshll.u32 (!%p192_p2), %s875_s19, 1  ;;  %p235_p4 = scmp.lt.s32.totalorder (!%p192_p2), %s875_s19, 1 }
   0x6   : > { %195 = sbr.rel (%p192_p2) target bundleno = 209 (0xd1), region = 36  ;;  %p224_p3 = scmp.lt.s32.totalorder (!%p192_p2), %s685_s26, 3 }
   0xb   : > { %v795_v0 = vld [vmem:[%s982_s3 + $0x38] sm:$0xff]  ;;  %v794_v3 = vld [vmem:[%s982_s3 + $0x30] sm:$0xff]  ;;  %v257_v5 = vlaneseq  ;;  %s986_s26 = smov (!%p224_p3, %s685_s26), 3  ;;  %v793_v7 = vld [vmem:[%s982_s3 + $0x28] sm:$0xff]  ;;  %s988_s19 = smov (!%p235_p4, %s875_s19), 1  ;;  %vm590_vm4 = vcmask 1040384  }
   0xc   : > { %v803_v1 = vld [vmem:[%s982_s3 + $0x78] sm:$0xff]  ;;  %526 = vmatpush.bf16.msra.mxu0 %v795_v0  ;;  %v802_v4 = vld [vmem:[%s982_s3 + $0x70] sm:$0xff]  ;;  %s686_s8 = sshll.u32 %s986_s26, 2  ;;  %v801_v8 = vld [vmem:[%s982_s3 + $0x68] sm:$0xff]  ;;  %s689_s26 = sshll.u32 %s988_s19, 1 }
   0xd   : > { %v811_v2 = vld [vmem:[%s982_s3 + $0xb8] sm:$0xff]  ;;  %540 = vmatpush.bf16.msra.mxu1 %v803_v1  ;;  %v810_v6 = vld [vmem:[%s982_s3 + $0xb0] sm:$0xff]  ;;  %s227_s15 = scalar_lea.vmem %s979_s0, %s686_s8  ;;  %v258_v9 = vshrl.u32 %v257_v5, 7  ;;  %v809_v10 = vld [vmem:[%s982_s3 + $0xa8] sm:$0xff]  ;;  %s233_s12 = scalar_lea.vmem %s983_s4, %s686_s8 }
   0xe   : > { %554 = vmatpush.bf16.msra.mxu2 %v811_v2  ;;  %v813_v11 = vld [vmem:[%s227_s15] sm:$0xff]   ;;  %v791_v25 = vld [vmem:[%s982_s3 + $0x18] sm:$0xff]  ;;  %v790_v33 = vld [vmem:[%s982_s3 + $0x10] sm:$0xff]  ;;  %s238_s14 = scalar_lea.vmem %s984_s5, %s689_s26 }
   0xf   : > { %v829_v12 = vld [vmem:[%s980_s1] ss:$0 sm:$0xff]  ;;  %v814_v13 = vunpack.c.l.bf16 %v813_v11  ;;  %v815_v14 = vunpack.c.h.bf16 %v813_v11  ;;  %v259_v18 = vadd.s32 8, %v258_v9  ;;  %v264_v24 = vand.u32 15, %v258_v9  ;;  %v799_v26 = vld [vmem:[%s982_s3 + $0x58] sm:$0xff]  ;;  %v798_v34 = vld [vmem:[%s982_s3 + $0x50] sm:$0xff] }
  0x10   : > { %527 = vmatpush.bf16.msra.mxu0 %v794_v3  ;;  %v830_v15 = vld [vmem:[%s981_s2] ss:$0 sm:$0xff]  ;;  %v807_v28 = vld [vmem:[%s982_s3 + $0x98] sm:$0xff]  ;;  %vm288_vm0 = vcmp.lt.s32.totalorder %v258_v9, 1  ;;  %vm301_vm2 = vcmp.lt.s32.totalorder %v258_v9, 7  ;;  %v806_v37 = vld [vmem:[%s982_s3 + $0x90] sm:$0xff] }
  0x11   : > { %541 = vmatpush.bf16.msra.mxu1 %v802_v4  ;;  %v792_v16 = vld [vmem:[%s982_s3 + $0x20] sm:$0xff]  ;;  %v247_v20 = vmul.f32 %v829_v12, %v814_v13  ;;  %v248_v21 = vmul.f32 %v829_v12, %v815_v14  ;;  %v271_v27 = vand.u32 15, %v259_v18  ;;  %vm284_vm1 = vcmp.gt.s32.totalorder %v264_v24, 0  ;;  %v789_v48 = vld [vmem:[%s982_s3 + $0x8] sm:$0xff] }
  0x12   : > { %555 = vmatpush.bf16.msra.mxu2 %v810_v6  ;;  %v800_v17 = vld [vmem:[%s982_s3 + $0x60] sm:$0xff]  ;;  %v797_v49 = vld [vmem:[%s982_s3 + $0x48] sm:$0xff] }
  0x13   : > { %v808_v19 = vld [vmem:[%s982_s3 + $0xa0] sm:$0xff]  ;;  %v253_v22 = vadd.f32 %v830_v15, %v247_v20  ;;  %v254_v23 = vadd.f32 %v830_v15, %v248_v21  ;;  %vm298_vm3 = vcmp.lt.s32.totalorder %v271_v27, 15  ;;  %v805_v52 = vld [vmem:[%s982_s3 + $0x88] sm:$0xff] }
  0x14   : > { %528 = vmatpush.bf16.msra.mxu0 %v793_v7  ;;  %v788_v57 = vld [vmem:[%s982_s3] sm:$0xff] }
  0x15   : > { %542 = vmatpush.bf16.msra.mxu1 %v801_v8  ;;  %v255_v29 = vmax.f32 %v253_v22, 0.0  ;;  %v256_v30 = vmax.f32 %v254_v23, 0.0  ;;  %v796_v58 = vld [vmem:[%s982_s3 + $0x40] sm:$0xff] }
  0x16   : > { %556 = vmatpush.bf16.msra.mxu2 %v809_v10  ;;  %v804_v61 = vld [vmem:[%s982_s3 + $0x80] sm:$0xff] }
  0x17   : > { %v286_v31 = vrot.slane %v255_v29, 7  ;;  %v287_v32 = vrot.slane %v256_v30, 7  ;;  %v299_v35 = vrot.slane %v255_v29, 1  ;;  %v300_v36 = vrot.slane %v256_v30, 1 }
  0x18   : > { %529 = vmatpush.bf16.msra.mxu0 %v792_v16  ;;  %v312_v41 = vpack.c.bf16 %v255_v29, %v255_v29  ;;  %v313_v46 = vpack.c.bf16 %v256_v30, %v256_v30 }
  0x19   : > { %543 = vmatpush.bf16.msra.mxu1 %v800_v17  ;;  %v289_v38 = vsel %vm288_vm0, %v286_v31, %v287_v32  ;;  %v290_v39 = vsel %vm288_vm0, %v287_v32, %v286_v31  ;;  %v302_v42 = vsel %vm301_vm2, %v299_v35, %v300_v36  ;;  %v303_v43 = vsel %vm301_vm2, %v300_v36, %v299_v35 }
  0x1a   : > { %557 = vmatpush.bf16.msra.mxu2 %v808_v19  ;;  %v295_v40 = vsel %vm284_vm1, %v290_v39, 0.0  ;;  %v311_v45 = vpack.c.bf16 %v289_v38, %v289_v38  ;;  %v309_v47 = vsel %vm298_vm3, %v303_v43, 0.0  ;;  %v314_v50 = vpack.c.bf16 %v302_v42, %v302_v42 }
  0x1b   : > { %v310_v44 = vpack.c.bf16 %v295_v40, %v295_v40  ;;  %v315_v51 = vpack.c.bf16 %v309_v47, %v309_v47  ;;  %v324_v55 = vunpack.c.l.b16 %v312_v41  ;;  %v325_v56 = vunpack.c.l.b16 %v313_v46 }
  0x1c   : > { %530 = vmatpush.bf16.msra.mxu0 %v791_v25  ;;  %v319_v54 = vunpack.c.l.b16 %v311_v45  ;;  %v330_v59 = vunpack.c.l.b16 %v314_v50 }
  0x1d   : > { %544 = vmatpush.bf16.msra.mxu1 %v799_v26  ;;  %v318_v53 = vunpack.c.l.b16 %v310_v44  ;;  %v331_v60 = vunpack.c.l.b16 %v315_v51  ;;  %v326_v63 = vpack.c.b16 %v325_v56, %v324_v55 }
  0x1e   : > { %558 = vmatpush.bf16.msra.mxu2 %v807_v28 }
  0x1f   : > { %v320_v62 = vpack.c.b16 %v319_v54, %v318_v53  ;;  %v332_v0 = vpack.c.b16 %v331_v60, %v330_v59 }
  0x20   : > { %531 = vmatpush.bf16.msra.mxu0 %v790_v33 }
  0x21   : > { %545 = vmatpush.bf16.msra.mxu1 %v798_v34 }
  0x22   : > { %559 = vmatpush.bf16.msra.mxu2 %v806_v37 }
  0x24   : > { %532 = vmatpush.bf16.msra.mxu0 %v789_v48 }
  0x25   : > { %546 = vmatpush.bf16.msra.mxu1 %v797_v49 }
  0x26   : > { %560 = vmatpush.bf16.msra.mxu2 %v805_v52 }
  0x28   : > { %533 = vmatpush.bf16.msra.mxu0 %v788_v57 }
  0x29   : > { %547 = vmatpush.bf16.msra.mxu1 %v796_v58 }
  0x2a   : > { %561 = vmatpush.bf16.msra.mxu2 %v804_v61 }
  0x2b   : > { %534 = vmatmul.bf16.vlgmr.msra.gmra.mxu0 %v320_v62 }
  0x2c   : > { %548 = vmatmul.bf16.vlgmr.msra.gmra.mxu1 %v326_v63 }
  0x2d   : > { %562 = vmatmul.bf16.vlgmr.msra.gmra.mxu2 %v332_v0 }
  0xa8   : > { %v535_v1 = vpop.f32.mrf.mxu0 }
  0xa9   : > { %v549_v2 = vpop.f32.mrf.mxu1 }
  0xaa   : > { %v550_v3 = vadd.f32 %v549_v2, %v535_v1 }
  0xb0   : > { %v563_v4 = vpop.f32.mrf.mxu2  ;;  %v537_v6 = vpop.f32.mrf.mxu0 }
  0xb1   : > { %v564_v5 = vadd.f32 %v563_v4, %v550_v3  ;;  %v551_v7 = vpop.f32.mrf.mxu1 }
  0xb2   : > { %v552_v9 = vadd.f32 %v551_v7, %v537_v6 }
  0xb3   : > { %v568_v8 = vpack.c.bf16 %v564_v5, %v564_v5 }
  0xb5   : > { %v572_v12 = vunpack.c.l.bf16 %v568_v8 }
  0xb7   : > { %v581_v16 = vmul.f32 %v572_v12, %v572_v12 }
  0xb8   : > { %v565_v10 = vpop.f32.mrf.mxu2 }
  0xb9   : > { %v566_v11 = vadd.f32 %v565_v10, %v552_v9 }
  0xbb   : > { %v569_v13 = vpack.c.bf16 %v566_v11, %v566_v11  ;;  %v819_v14 = vpack.c.bf16 %v566_v11, %v564_v5 }
  0xbd   : > { %820 = vst [vmem:[%s233_s12] sm:$0xff] %v819_v14   ;;  %v573_v15 = vunpack.c.l.bf16 %v569_v13 }
  0xbf   : > { %v574_v17 = vadd.f32 %v573_v15, %v572_v12  ;;  %v582_v18 = vmul.f32 %v573_v15, %v573_v15 }
  0xc1   : > { %v575_v19 = vrot.slane %v574_v17, 4  ;;  %v583_v20 = vadd.f32 %v582_v18, %v581_v16 }
  0xc3   : > { %v576_v21 = vadd.f32 %v575_v19, %v574_v17  ;;  %v584_v22 = vrot.slane %v583_v20, 4 }
  0xc5   : > { %v577_v23 = vrot.slane %v576_v21, 2  ;;  %v585_v24 = vadd.f32 %v584_v22, %v583_v20 }
  0xc7   : > { %v578_v25 = vadd.f32 %v577_v23, %v576_v21  ;;  %v586_v26 = vrot.slane %v585_v24, 2 }
  0xc9   : > { %v579_v27 = vrot.slane %v578_v25, 1  ;;  %v587_v28 = vadd.f32 %v586_v26, %v585_v24 }
  0xcb   : > { %v588_v29 = vrot.slane %v587_v28, 1  ;;  %v580_v30 = vadd.f32 %v579_v27, %v578_v25 }
  0xcd   : > { %v589_v31 = vadd.f32 %v588_v29, %v587_v28 }
  0xcf   : > { %v591_v32 = vsel %vm590_vm4, %v580_v30, %v589_v31 }
  0xd0   : > { %592 = vst [vmem:[%s238_s14] sm:$0x3] %v591_v32 }
  0xd1 PF: > { %s16_s18 = sadd.s32 1, %s837_s18  }
  0xd2   : > { %p13_p5 = scmp.ge.s32.totalorder %s16_s18, 4  }
  0xd4   :  { %15 = sbr.rel (!%p13_p5) target bundleno = 1 (0x1), region = 78 }

</bundles_post_ra>
